<compile_context>
chip_gen: v5e
topology: v5e:2x2
jax: 0.10.0
libtpu: 0.0.40
codegen_flags: <defaults>
</compile_context>

<pallas_src>
import math

import jax
import jax.numpy as jnp
from jax.experimental import pallas as pl
from jax.experimental.pallas import tpu as pltpu


# ----------------------------------------------------------------------------
# "register_buffer" setup: deterministic table, built once in plain JAX.
# ----------------------------------------------------------------------------
def make_positional_encoding(d_model: int, max_len: int = 5000,
                             dtype=jnp.float32) -> jnp.ndarray:
    """Matches PositionalEncoding._get_timing_signal. Cast once here.

    Note: casting the buffer to bf16 here differs slightly from the torch
    module (where the f32 buffer promotes the add); negligible for PE
    magnitudes, but a documented semantic difference.
    """
    position = jnp.arange(max_len, dtype=jnp.float32)[:, None]          # (L, 1)
    div_term = jnp.exp(
        jnp.arange(0, d_model, 2, dtype=jnp.float32)
        * -(math.log(10000.0) / d_model)
    )                                                                    # (ceil(C/2),)
    angles = position * div_term                                         # (L, ceil(C/2))
    pe = jnp.zeros((max_len, d_model), dtype=jnp.float32)
    pe = pe.at[:, 0::2].set(jnp.sin(angles))
    pe = pe.at[:, 1::2].set(jnp.cos(angles)[:, : d_model // 2])
    return pe[None, :, :].astype(dtype)                                  # (1, L, C)


# ----------------------------------------------------------------------------
# Kernel: lane-dense (optionally sublane-broadcast) add.
# ----------------------------------------------------------------------------
def _add_pe_kernel(x_ref, pe_ref, o_ref):
    # x_ref:  (rows, tile_f)
    # pe_ref: (rows, tile_f) in the sublane-fill path, (1, tile_f) otherwise
    #         (broadcast over the sublane/batch axis).
    o_ref[...] = x_ref[...] + pe_ref[...]


# ----------------------------------------------------------------------------
# Generation-aware budgets (trace-time query, conservative fallback = v7x).
# ----------------------------------------------------------------------------
def _hw_budgets():
    """Returns (target x-tile bytes, vmem_limit_bytes)."""
    vmem_cap = 64 << 20                          # assume v7x-class if unknown
    try:
        info = pltpu.get_tpu_info()
        cap = getattr(info, "vmem_capacity_bytes", None)
        if cap:
            vmem_cap = int(cap)
    except Exception:
        pass
    if vmem_cap > (96 << 20):                    # v5e / v6e: 128 MiB physical
        return 8 << 20, 64 << 20
    return 4 << 20, 40 << 20                     # v7x: 64 MiB per TensorCore


# ----------------------------------------------------------------------------
# Forward wrapper.
# ----------------------------------------------------------------------------
def positional_encoding_forward(x: jnp.ndarray, pe: jnp.ndarray,
                                *, donate_x: bool = False) -> jnp.ndarray:
    """x: (B, S, D); pe: (1, max_len, D), same dtype as x. Returns x + pe[:, :S].

    Set donate_x=True ONLY if the caller donates x (jax.jit donate_argnums);
    aliasing a non-donated input triggers a defensive full copy inside XLA.
    """
    B, S, D = x.shape
    one, max_len, Dp = pe.shape
    assert one == 1 and Dp == D and S <= max_len
    assert pe.dtype == x.dtype, "cast the pe buffer to the model dtype at init"

    itemsize = jnp.dtype(x.dtype).itemsize
    sub = max(8, 32 // itemsize)                 # sublane rows per packed vreg
    target_tile_bytes, vmem_limit = _hw_budgets()

    F = S * D
    pe_flat_len = max_len * D

    def _lane_tile(total_lanes: int, rows: int) -> int:
        # Lane tile: multiple of 128, sized so one x tile is ~target_tile_bytes.
        cap = max(128, (target_tile_bytes // (rows * itemsize)) // 128 * 128)
        return min(pl.cdiv(total_lanes, 128) * 128, cap)

    use_fill = (B < sub) and (F % (sub * 128) == 0)

    if use_fill:
        # ---- sublane-fill path: every vreg/vst uses all sublanes ------------
        F2 = F // sub
        x2 = x.reshape(B * sub, F2)              # contiguous collapse, no copy
        if pe_flat_len % F2 == 0:
            # Zero-copy: rows 0..sub-1 of this reshape are exactly
            # pe[:, :S, :] flattened row-major.
            pe2 = pe.reshape(pe_flat_len // F2, F2)
        else:
            # Fallback: small wrapper-side window copy (F elements) when the
            # full buffer cannot be reshaped compatibly.
            pe2 = pe.reshape(-1)[:F].reshape(sub, F2)
        rows = sub
        tile_f = _lane_tile(F2, rows)
        # Megacore: keep >=2 lane tiles when the batch axis has a single block.
        if B == 1 and tile_f >= F2 and F2 >= 256:
            tile_f = max(128, ((F2 // 2) // 128) * 128)
        grid = (pl.cdiv(F2, tile_f), B)          # batch innermost
        in_specs = [
            pl.BlockSpec((rows, tile_f), lambda f, b: (b, f)),
            pl.BlockSpec((rows, tile_f), lambda f, b: (0, f)),  # batch-invariant
        ]
        out_spec = pl.BlockSpec((rows, tile_f), lambda f, b: (b, f))
        out_shape2 = (B * sub, F2)
    else:
        # ---- general broadcast path -----------------------------------------
        x2 = x.reshape(B, F)                     # contiguous collapse, no copy
        pe2 = pe.reshape(1, pe_flat_len)         # first F elems == pe[:, :S, :]
        rows = B if B < sub else sub             # dtype-aware sublane tile
        tile_f = _lane_tile(F, rows)
        b_tiles = pl.cdiv(B, rows)
        # Megacore: keep >=2 lane tiles when the batch axis has a single block.
        if b_tiles == 1 and tile_f >= F and F >= 256:
            tile_f = max(128, ((F // 2) // 128) * 128)
        grid = (pl.cdiv(F, tile_f), b_tiles)     # batch innermost
        in_specs = [
            pl.BlockSpec((rows, tile_f), lambda f, b: (b, f)),
            pl.BlockSpec((1, tile_f), lambda f, b: (0, f)),     # batch-invariant
        ]
        out_spec = pl.BlockSpec((rows, tile_f), lambda f, b: (b, f))
        out_shape2 = (B, F)

    out2 = pl.pallas_call(
        _add_pe_kernel,
        out_shape=jax.ShapeDtypeStruct(out_shape2, x.dtype),
        grid_spec=pltpu.PrefetchScalarGridSpec(
            num_scalar_prefetch=0,
            grid=grid,
            in_specs=in_specs,
            out_specs=out_spec,
        ),
        input_output_aliases=({0: 0} if donate_x else {}),
        compiler_params=pltpu.CompilerParams(
            dimension_semantics=("parallel", "parallel"),
            vmem_limit_bytes=vmem_limit,
        ),
    )(x2, pe2)

    return out2.reshape(B, S, D)


# ----------------------------------------------------------------------------
# Test (exercises both code paths)
# ----------------------------------------------------------------------------
if __name__ == "__main__":
    MAX_LEN = 64  # stand-in for max_len=5000 at small scale
    fwd = jax.jit(positional_encoding_forward, static_argnames=("donate_x",))
    key = jax.random.PRNGKey(0)

    # Case 1: general broadcast path (F = 256, not a multiple of 8*128).
    B, S, D = 2, 8, 32
    k1, k2 = jax.random.split(key)
    x1 = jax.random.normal(k1, (B, S, D), dtype=jnp.float32)
    pe1 = make_positional_encoding(D, MAX_LEN, dtype=jnp.float32)
    ref1 = x1 + pe1[:, :S, :]
    out1 = jax.block_until_ready(fwd(x1, pe1))
    assert out1.shape == (B, S, D)
    assert jnp.allclose(out1, ref1, atol=1e-6, rtol=1e-6)

    # Case 2: sublane-fill path (B=1, F = 1024 = 8*128, zero-copy pe window).
    B2, S2, D2 = 1, 32, 32
    x2 = jax.random.normal(k2, (B2, S2, D2), dtype=jnp.float32)
    pe2 = make_positional_encoding(D2, MAX_LEN, dtype=jnp.float32)
    ref2 = x2 + pe2[:, :S2, :]
    out2 = jax.block_until_ready(fwd(x2, pe2))
    assert out2.shape == (B2, S2, D2)
    assert jnp.allclose(out2, ref2, atol=1e-6, rtol=1e-6)

    print("KERNEL_OK")
</pallas_src>

<mosaic_0001>
module attributes {stable_mosaic.version = 11 : i64} {
  func.func @_add_pe_kernel(%arg0: i32, %arg1: i32, %arg2: memref<2x128xf32, #tpu.memory_space<vmem>>, %arg3: memref<1x128xf32, #tpu.memory_space<vmem>>, %arg4: memref<2x128xf32, #tpu.memory_space<vmem>>) attributes {dimension_semantics = [#tpu.dimension_semantics<parallel>, #tpu.dimension_semantics<parallel>], iteration_bounds = array<i64: 2, 1>, scalar_prefetch = 0 : i64, scratch_operands = 0 : i64, tpu.core_type = #tpu.core_type<tc>, window_params = [{transform_indices = @transform_0, window_bounds = array<i64: 2, 128>}, {transform_indices = @transform_1, window_bounds = array<i64: 1, 128>}, {transform_indices = @transform_2, window_bounds = array<i64: 2, 128>}]} {
    %c0 = arith.constant 0 : index
    %c0_0 = arith.constant 0 : index
    %0 = vector.load %arg2[%c0, %c0_0] : memref<2x128xf32, #tpu.memory_space<vmem>>, vector<2x128xf32>
    %c0_1 = arith.constant 0 : index
    %c0_2 = arith.constant 0 : index
    %1 = vector.load %arg3[%c0_1, %c0_2] : memref<1x128xf32, #tpu.memory_space<vmem>>, vector<1x128xf32>
    %2 = vector.broadcast %1 : vector<1x128xf32> to vector<2x128xf32>
    %3 = arith.addf %0, %2 : vector<2x128xf32>
    %c0_3 = arith.constant 0 : index
    %c0_4 = arith.constant 0 : index
    %4 = vector.load %arg4[%c0_3, %c0_4] : memref<2x128xf32, #tpu.memory_space<vmem>>, vector<2x128xf32>
    tpu.vector_store %arg4[%c0_3, %c0_4], %3 {strides = array<i32>} : memref<2x128xf32, #tpu.memory_space<vmem>>, vector<2x128xf32>,
    return
  }
  func.func @transform_0(%arg0: i32, %arg1: i32) -> (i32, i32) {
    %c0_i32 = arith.constant 0 : i32
    return %arg1, %arg0 : i32, i32
  }
  func.func @transform_1(%arg0: i32, %arg1: i32) -> (i32, i32) {
    %c0_i32 = arith.constant 0 : i32
    %c0_i32_0 = arith.constant 0 : i32
    return %c0_i32, %arg0 : i32, i32
  }
  func.func @transform_2(%arg0: i32, %arg1: i32) -> (i32, i32) {
    %c0_i32 = arith.constant 0 : i32
    return %arg1, %arg0 : i32, i32
  }
}

</mosaic_0001>

<bundles_post_ra>
// kernel: positional_encoding_forward.1
= control target key start
LH: loop header
LB: loop body
LE: loop exit
PB: predicated region body
PF: predicated region fallthrough
CT: control target
= control target key end

     0   :  { %s361_s9 = smov 0   ;;  %s363_s10 = smov 0   ;;  %s385_s0 = inlined_call_operand.vmem [shape: f32[2,256], index: 0, kind: input, shape index: {}]   ;;  %s386_s1 = inlined_call_operand.vmem [shape: f32[1,2048], index: 1, kind: input, shape index: {}]   ;;  %s387_s2 = inlined_call_operand.vmem [shape: f32[2,256], index: 2, kind: output, shape index: {}]  }
   0x1   :  { %s365_s11 = smov 0  }
   0x2 LB: > { %s24_s12 = sadd.s32 1, %s340_s10  ;;  %p292_p0 = scmp.ge.s32.totalorder %s344_s11, 1  ;;  %s344_s11 = sphi %s365_s11, %s12_s11   ;;  %s340_s10 = sphi %s363_s10, %s389_s10   ;;  %s336_s9 = sphi %s361_s9, %s388_s9  }
   0x3   : > { %p26_p1 = scmp.ge.s32.totalorder %s24_s12, 2  ;;  %p139_p2 = scmp.lt.s32.totalorder %s344_s11, 3 }
   0x5   : > { %s391_s12 = smov (%p26_p1, %s24_s12), 0  ;;  %p140_p3 = pnand %p292_p0, %p139_p2 }
   0x6   : > { %p172_p4 = scmp.lt.s32.totalorder (!%p140_p3), %s336_s9, 1  ;;  %p178_p5 = scmp.lt.s32.totalorder (!%p140_p3), %s336_s9, 15 }
   0x7   : > { %143 = sbr.rel (%p140_p3) target bundleno = 20 (0x14), region = 28 }
   0xc   : > { %s173_s13 = scalar_select %p172_p4, %s336_s9, 1 }
   0xd   : > { %s393_s9 = smov (!%p178_p5, %s336_s9), 15 }
   0xe   : > { %s293_s14 = sshll.u32 %s173_s13, 1  ;;  %s180_s20 = scalar_lea.vmem %s386_s1, %s393_s9 }
   0xf   : > { %s177_s17 = scalar_lea.vmem %s385_s0, %s293_s14  ;;  %v321_v1 = vld [vmem:[%s180_s20] ss:$0 sm:$0xff]  ;;  %s188_s23 = scalar_lea.vmem %s387_s2, %s293_s14 }
  0x10   : > { %v189_v0 = vld [vmem:[%s177_s17] sm:$0x3] }
  0x11   : > { %v194_v2 = vadd.f32 %v321_v1, %v189_v0 }
  0x13   : > { %195 = vst [vmem:[%s188_s23] sm:$0x3] %v194_v2 }
  0x14 PF: > { %s12_s11 = sadd.s32 1, %s344_s11   ;;  %s388_s9 = smov %s340_s10 }
  0x15   : > { %p9_p6 = scmp.ge.s32.totalorder %s12_s11, 4   ;;  %s389_s10 = smov %s391_s12 }
  0x17   :  { %11 = sbr.rel (!%p9_p6) target bundleno = 2 (0x2), region = 61 }

</bundles_post_ra>
